<compile_context>
chip_gen: v7x
topology: tpu7x:2x2x1
jax: 0.10.0
libtpu: 0.0.40
codegen_flags: <defaults>
</compile_context>

<pallas_src>
import functools

import jax
import jax.numpy as jnp
from jax.experimental import pallas as pl
from jax.experimental.pallas import tpu as pltpu


def _attention_gated_kernel(x_ref, wv_ref, bv_ref, wu_ref, bu_ref, wa_ref, ba_ref, out_ref):
    """Fused gated-attention MIL pooling.

    x_ref:   (N, L)  instance features
    wv_ref:  (L, D)  attention_V Linear weight, pre-transposed
    bv_ref:  (1, D)
    wu_ref:  (L, D)  attention_U Linear weight, pre-transposed
    bu_ref:  (1, D)
    wa_ref:  (D, K)  attention_weights Linear weight, pre-transposed
    ba_ref:  (1, K)
    out_ref: (K, L)  attention-pooled bag feature(s)
    """
    x = x_ref[...].astype(jnp.float32)                                        # (N, L)

    # Gated attention MLP: contraction depth L (=512) -> MXU; tanh/sigmoid on EUP slot.
    av = jnp.tanh(
        jnp.dot(x, wv_ref[...], preferred_element_type=jnp.float32) + bv_ref[...])
    au = jax.nn.sigmoid(
        jnp.dot(x, wu_ref[...], preferred_element_type=jnp.float32) + bu_ref[...])
    gated = av * au                                                           # (N, D)

    logits = jnp.dot(gated, wa_ref[...], preferred_element_type=jnp.float32) + ba_ref[...]  # (N, K)

    # Softmax over the instance axis (torch: transpose(1,0) then softmax(dim=1)).
    m = jnp.max(logits, axis=0, keepdims=True)                                # (1, K)
    p = jnp.exp(logits - m)                                                   # (N, K) EUP
    a = p / jnp.sum(p, axis=0, keepdims=True)                                 # (N, K)

    k = out_ref.shape[0]
    if k == 1:
        # Weighted sum on VPU + sublane reduce; keeps the (1, L) output lane-dense
        # and avoids an M=1 MXU issue plus a (N,1)->(1,N) transpose.
        out = jnp.sum(a * x, axis=0, keepdims=True)                           # (1, L)
    else:
        out = jnp.dot(a.T, x, preferred_element_type=jnp.float32)             # (K, L)
    out_ref[...] = out.astype(out_ref.dtype)


def prepare_params(params):
    """Hoisted, once-per-model parameter prep (transposes / reshapes / casts)."""
    d, l = params["wv"].shape
    k = params["wa"].shape[0]
    return {
        "wv_t": params["wv"].T.astype(jnp.float32),            # (L, D)
        "bv": params["bv"].reshape(1, d).astype(jnp.float32),
        "wu_t": params["wu"].T.astype(jnp.float32),             # (L, D)
        "bu": params["bu"].reshape(1, d).astype(jnp.float32),
        "wa_t": params["wa"].T.astype(jnp.float32),              # (D, K)
        "ba": params["ba"].reshape(1, k).astype(jnp.float32),
    }


def attention_gated_forward(x, prepped):
    """Pallas implementation of Attention_Gated.forward. x: (N, L) f32."""
    n, l = x.shape
    d = prepped["wv_t"].shape[1]
    k = prepped["wa_t"].shape[1]

    out = pl.pallas_call(
        _attention_gated_kernel,
        out_shape=jax.ShapeDtypeStruct((k, l), jnp.float32),
        grid=(1,),
        in_specs=[
            pl.BlockSpec((n, l), lambda i: (0, 0)),      # x
            pl.BlockSpec((l, d), lambda i: (0, 0)),      # Wv^T
            pl.BlockSpec((1, d), lambda i: (0, 0)),      # bv
            pl.BlockSpec((l, d), lambda i: (0, 0)),      # Wu^T
            pl.BlockSpec((1, d), lambda i: (0, 0)),      # bu
            pl.BlockSpec((d, k), lambda i: (0, 0)),      # Wa^T
            pl.BlockSpec((1, k), lambda i: (0, 0)),      # ba
        ],
        out_specs=pl.BlockSpec((k, l), lambda i: (0, 0)),
        compiler_params=pltpu.CompilerParams(
            dimension_semantics=("arbitrary",)),
    )(x.astype(jnp.float32), prepped["wv_t"], prepped["bv"],
      prepped["wu_t"], prepped["bu"], prepped["wa_t"], prepped["ba"])
    return out


def attention_gated_reference(x, params):
    """Pure-JAX reference mirroring the torch forward."""
    av = jnp.tanh(x @ params["wv"].T + params["bv"])
    au = jax.nn.sigmoid(x @ params["wu"].T + params["bu"])
    logits = (av * au) @ params["wa"].T + params["ba"]          # (N, K)
    a = jax.nn.softmax(logits.T, axis=1)                        # (K, N)
    return a @ x                                                # (K, L)


if __name__ == "__main__":
    key = jax.random.PRNGKey(0)
    L, D, K, N = 512, 128, 1, 16                               # module defaults, small bag

    ks = jax.random.split(key, 8)
    x = jax.random.normal(ks[0], (N, L), jnp.float32)
    params = {
        "wv": jax.random.normal(ks[1], (D, L), jnp.float32) / jnp.sqrt(L),
        "bv": 0.01 * jax.random.normal(ks[2], (D,), jnp.float32),
        "wu": jax.random.normal(ks[3], (D, L), jnp.float32) / jnp.sqrt(L),
        "bu": 0.01 * jax.random.normal(ks[4], (D,), jnp.float32),
        "wa": jax.random.normal(ks[5], (K, D), jnp.float32) / jnp.sqrt(D),
        "ba": 0.01 * jax.random.normal(ks[6], (K,), jnp.float32),
    }

    prepped = prepare_params(params)
    out = attention_gated_forward(x, prepped)
    out = jax.block_until_ready(out)

    ref = attention_gated_reference(x, params)
    assert out.shape == ref.shape, (out.shape, ref.shape)
    err = float(jnp.max(jnp.abs(out - ref)))
    assert err < 2e-3, f"kernel output mismatch vs reference: {err}"
    print("KERNEL_OK")
</pallas_src>

<mosaic_0001>
module attributes {stable_mosaic.version = 11 : i64} {
  func.func @_attention_gated_kernel(%arg0: i32, %arg1: memref<16x512xf32, #tpu.memory_space<vmem>>, %arg2: memref<512x128xf32, #tpu.memory_space<vmem>>, %arg3: memref<1x128xf32, #tpu.memory_space<vmem>>, %arg4: memref<512x128xf32, #tpu.memory_space<vmem>>, %arg5: memref<1x128xf32, #tpu.memory_space<vmem>>, %arg6: memref<128x1xf32, #tpu.memory_space<vmem>>, %arg7: memref<1x1xf32, #tpu.memory_space<vmem>>, %arg8: memref<1x512xf32, #tpu.memory_space<vmem>>) attributes {dimension_semantics = [#tpu.dimension_semantics<arbitrary>], iteration_bounds = array<i64: 1>, scalar_prefetch = 0 : i64, scratch_operands = 0 : i64, tpu.core_type = #tpu.core_type<tc>, window_params = [{pipeline_mode = #tpu.pipeline_mode<synchronous>, transform_indices = @transform_0, window_bounds = array<i64: 16, 512>}, {pipeline_mode = #tpu.pipeline_mode<synchronous>, transform_indices = @transform_1, window_bounds = array<i64: 512, 128>}, {pipeline_mode = #tpu.pipeline_mode<synchronous>, transform_indices = @transform_2, window_bounds = array<i64: 1, 128>}, {pipeline_mode = #tpu.pipeline_mode<synchronous>, transform_indices = @transform_3, window_bounds = array<i64: 512, 128>}, {pipeline_mode = #tpu.pipeline_mode<synchronous>, transform_indices = @transform_4, window_bounds = array<i64: 1, 128>}, {pipeline_mode = #tpu.pipeline_mode<synchronous>, transform_indices = @transform_5, window_bounds = array<i64: 128, 1>}, {pipeline_mode = #tpu.pipeline_mode<synchronous>, transform_indices = @transform_6, window_bounds = array<i64: 1, 1>}, {pipeline_mode = #tpu.pipeline_mode<synchronous>, transform_indices = @transform_7, window_bounds = array<i64: 1, 512>}]} {
    %c0 = arith.constant 0 : index
    %c0_0 = arith.constant 0 : index
    %0 = vector.load %arg1[%c0, %c0_0] : memref<16x512xf32, #tpu.memory_space<vmem>>, vector<16x512xf32>
    %c0_1 = arith.constant 0 : index
    %c0_2 = arith.constant 0 : index
    %1 = vector.load %arg2[%c0_1, %c0_2] : memref<512x128xf32, #tpu.memory_space<vmem>>, vector<512x128xf32>
    %cst = arith.constant dense<0.000000e+00> : vector<16x128xf32>
    %2 = tpu.matmul %0, %1, %cst {dimension_numbers = #tpu.dot_dimension_numbers<[1], [0], [0], [1], [0, 0, 1, 1], [], []>} : vector<16x512xf32>, vector<512x128xf32>, vector<16x128xf32> -> vector<16x128xf32>
    %c0_3 = arith.constant 0 : index
    %c0_4 = arith.constant 0 : index
    %3 = vector.load %arg3[%c0_3, %c0_4] : memref<1x128xf32, #tpu.memory_space<vmem>>, vector<1x128xf32>
    %4 = vector.broadcast %3 : vector<1x128xf32> to vector<16x128xf32>
    %5 = arith.addf %2, %4 : vector<16x128xf32>
    %6 = math.tanh %5 : vector<16x128xf32>
    %c0_5 = arith.constant 0 : index
    %c0_6 = arith.constant 0 : index
    %7 = vector.load %arg4[%c0_5, %c0_6] : memref<512x128xf32, #tpu.memory_space<vmem>>, vector<512x128xf32>
    %cst_7 = arith.constant dense<0.000000e+00> : vector<16x128xf32>
    %8 = tpu.matmul %0, %7, %cst_7 {dimension_numbers = #tpu.dot_dimension_numbers<[1], [0], [0], [1], [0, 0, 1, 1], [], []>} : vector<16x512xf32>, vector<512x128xf32>, vector<16x128xf32> -> vector<16x128xf32>
    %c0_8 = arith.constant 0 : index
    %c0_9 = arith.constant 0 : index
    %9 = vector.load %arg5[%c0_8, %c0_9] : memref<1x128xf32, #tpu.memory_space<vmem>>, vector<1x128xf32>
    %10 = vector.broadcast %9 : vector<1x128xf32> to vector<16x128xf32>
    %11 = arith.addf %8, %10 : vector<16x128xf32>
    %12 = arith.negf %11 : vector<16x128xf32>
    %13 = math.exp %12 : vector<16x128xf32>
    %cst_10 = arith.constant 1.000000e+00 : f32
    %14 = vector.broadcast %cst_10 : f32 to vector<16x128xf32>
    %15 = arith.addf %14, %13 : vector<16x128xf32>
    %16 = arith.divf %14, %15 : vector<16x128xf32>
    %17 = arith.mulf %6, %16 : vector<16x128xf32>
    %c0_11 = arith.constant 0 : index
    %c0_12 = arith.constant 0 : index
    %18 = vector.load %arg6[%c0_11, %c0_12] : memref<128x1xf32, #tpu.memory_space<vmem>>, vector<128x1xf32>
    %cst_13 = arith.constant dense<0.000000e+00> : vector<16x1xf32>
    %19 = tpu.matmul %17, %18, %cst_13 {dimension_numbers = #tpu.dot_dimension_numbers<[1], [0], [0], [1], [0, 0, 1, 1], [], []>} : vector<16x128xf32>, vector<128x1xf32>, vector<16x1xf32> -> vector<16x1xf32>
    %c0_14 = arith.constant 0 : index
    %c0_15 = arith.constant 0 : index
    %20 = vector.load %arg7[%c0_14, %c0_15] : memref<1x1xf32, #tpu.memory_space<vmem>>, vector<1x1xf32>
    %21 = vector.broadcast %20 : vector<1x1xf32> to vector<16x1xf32>
    %22 = arith.addf %19, %21 : vector<16x1xf32>
    %cst_16 = arith.constant dense<0xFF800000> : vector<1xf32>
    %23 = vector.multi_reduction <maximumf>, %22, %cst_16 [0] : vector<16x1xf32> to vector<1xf32>
    %24 = vector.shape_cast %23 : vector<1xf32> to vector<1x1xf32>
    %25 = vector.broadcast %24 : vector<1x1xf32> to vector<16x1xf32>
    %26 = arith.subf %22, %25 : vector<16x1xf32>
    %27 = math.exp %26 : vector<16x1xf32>
    %cst_17 = arith.constant dense<0.000000e+00> : vector<1xf32>
    %28 = vector.multi_reduction <add>, %27, %cst_17 [0] : vector<16x1xf32> to vector<1xf32>
    %29 = vector.shape_cast %28 : vector<1xf32> to vector<1x1xf32>
    %30 = vector.broadcast %29 : vector<1x1xf32> to vector<16x1xf32>
    %31 = arith.divf %27, %30 : vector<16x1xf32>
    %32 = vector.broadcast %31 : vector<16x1xf32> to vector<16x512xf32>
    %33 = arith.mulf %32, %0 : vector<16x512xf32>
    %cst_18 = arith.constant dense<0.000000e+00> : vector<512xf32>
    %34 = vector.multi_reduction <add>, %33, %cst_18 [0] : vector<16x512xf32> to vector<512xf32>
    %35 = vector.shape_cast %34 : vector<512xf32> to vector<1x512xf32>
    %c0_19 = arith.constant 0 : index
    %c0_20 = arith.constant 0 : index
    %36 = vector.load %arg8[%c0_19, %c0_20] : memref<1x512xf32, #tpu.memory_space<vmem>>, vector<1x512xf32>
    tpu.vector_store %arg8[%c0_19, %c0_20], %35 {strides = array<i32>} : memref<1x512xf32, #tpu.memory_space<vmem>>, vector<1x512xf32>,
    return
  }
  func.func @transform_0(%arg0: i32) -> (i32, i32) {
    %c0_i32 = arith.constant 0 : i32
    %c0_i32_0 = arith.constant 0 : i32
    %c0_i32_1 = arith.constant 0 : i32
    return %c0_i32, %c0_i32_0 : i32, i32
  }
  func.func @transform_1(%arg0: i32) -> (i32, i32) {
    %c0_i32 = arith.constant 0 : i32
    %c0_i32_0 = arith.constant 0 : i32
    %c0_i32_1 = arith.constant 0 : i32
    return %c0_i32, %c0_i32_0 : i32, i32
  }
  func.func @transform_2(%arg0: i32) -> (i32, i32) {
    %c0_i32 = arith.constant 0 : i32
    %c0_i32_0 = arith.constant 0 : i32
    %c0_i32_1 = arith.constant 0 : i32
    return %c0_i32, %c0_i32_0 : i32, i32
  }
  func.func @transform_3(%arg0: i32) -> (i32, i32) {
    %c0_i32 = arith.constant 0 : i32
    %c0_i32_0 = arith.constant 0 : i32
    %c0_i32_1 = arith.constant 0 : i32
    return %c0_i32, %c0_i32_0 : i32, i32
  }
  func.func @transform_4(%arg0: i32) -> (i32, i32) {
    %c0_i32 = arith.constant 0 : i32
    %c0_i32_0 = arith.constant 0 : i32
    %c0_i32_1 = arith.constant 0 : i32
    return %c0_i32, %c0_i32_0 : i32, i32
  }
  func.func @transform_5(%arg0: i32) -> (i32, i32) {
    %c0_i32 = arith.constant 0 : i32
    %c0_i32_0 = arith.constant 0 : i32
    %c0_i32_1 = arith.constant 0 : i32
    return %c0_i32, %c0_i32_0 : i32, i32
  }
  func.func @transform_6(%arg0: i32) -> (i32, i32) {
    %c0_i32 = arith.constant 0 : i32
    %c0_i32_0 = arith.constant 0 : i32
    %c0_i32_1 = arith.constant 0 : i32
    return %c0_i32, %c0_i32_0 : i32, i32
  }
  func.func @transform_7(%arg0: i32) -> (i32, i32) {
    %c0_i32 = arith.constant 0 : i32
    %c0_i32_0 = arith.constant 0 : i32
    %c0_i32_1 = arith.constant 0 : i32
    return %c0_i32, %c0_i32_0 : i32, i32
  }
}

</mosaic_0001>

<bundles_post_ra>
// kernel: tpu_custom_call.1
= control target key start
LH: loop header
LB: loop body
LE: loop exit
PB: predicated region body
PF: predicated region fallthrough
CT: control target
= control target key end

     0   :  { %s1421_s0 = inlined_call_operand.vmem [shape: f32[16,512], index: 0, kind: input, shape index: {}]   ;;  %s1422_s1 = inlined_call_operand.hbm [shape: f32[512,128], index: 1, kind: input, shape index: {}]   ;;  %s1423_s2 = inlined_call_operand.vmem [shape: f32[1,128], index: 2, kind: input, shape index: {}]   ;;  %s1424_s3 = inlined_call_operand.hbm [shape: f32[512,128], index: 3, kind: input, shape index: {}]   ;;  %s1425_s4 = inlined_call_operand.vmem [shape: f32[1,128], index: 4, kind: input, shape index: {}]   ;;  %s1426_s5 = inlined_call_operand.vmem [shape: f32[128,1], index: 5, kind: input, shape index: {}]   ;;  %s1427_s6 = inlined_call_operand.<no memory space> [shape: f32[1,1], index: 6, kind: input, shape index: {}]   ;;  %s1428_s7 = inlined_call_operand.hbm [shape: f32[1,512], index: 7, kind: output, shape index: {}]  }
   0x1   :  { %v12_v0 = vstv %s1427_s6 }
   0x2   :  { %13 = vst [vmem:[#allocation2] sm:$0x1] %v12_v0 }
   0x3   :  { %14 = vsyncpa [#allocation4], 0 }
   0x4   :  { %15 = vsyncpa [#allocation7], 0 }
   0x5   :  { %16 = vsyncpa [#allocation5], 0  ;;  %s1213_s26 = smov [#allocation3]   ;;  %s1141_s30 = scalar_lea.hbm %s1422_s1, 8192 }
   0x6   :  { %s24_s27 = sshll.u32 %s1213_s26, 4  ;;  %p1142_p0 = scmp.ne.s32.totalorder %s1422_s1, %s1141_s30  ;;  %s25_s27 = int_to_ptr.vmem [resolvable:$true] %s24_s27 }
   0x7   :  { %p1145_p1 = scmp.lt.u32.totalorder %s1141_s30, %s1422_s1 }
   0x9   :  { %p1147_p2 = pnand %p1145_p1, %p1142_p0 }
   0xb   :  { %1150 = shalt.err (!%p1147_p2)
}
   0xc   :  { %s1151_s6 = scalar_lea.vmem %s25_s27, 8192  ;;  %p1156_p4 = scmp.lt.s32.totalorder %s25_s27, %s25_s27 }
   0xd   :  { %p1152_p3 = scmp.ne.s32.totalorder %s25_s27, %s1151_s6  ;;  %p1157_p5 = scmp.lt.s32.totalorder %s1151_s6, %s1151_s6 }
   0xf   :  { %p1158_p6 = por %p1157_p5, %p1156_p4 }
  0x11   :  { %p1159_p7 = pnand %p1158_p6, %p1152_p3 }
  0x13   :  { %1162 = shalt.err (!%p1159_p7)
}
  0x14   :  { %s1214_s12 = smov 128   ;;  %s1215_s13 = smov 8  }
  0x15   :  { %30 = dma.hbm_to_vmem [thread:$0]  %s1422_s1, 8192, %s25_s27, [#allocation4], %s1214_s12, %s1214_s12, %s1215_s13  }
  0x16   :  { %s1216_s16 = smov [#allocation6]   ;;  %s1163_s20 = scalar_lea.hbm %s1424_s3, 8192 }
  0x17   :  { %s38_s17 = sshll.u32 %s1216_s16, 4  ;;  %p1164_p8 = scmp.ne.s32.totalorder %s1424_s3, %s1163_s20  ;;  %s39_s17 = int_to_ptr.vmem [resolvable:$true] %s38_s17 }
  0x18   :  { %p1167_p9 = scmp.lt.u32.totalorder %s1163_s20, %s1424_s3 }
  0x1a   :  { %p1169_p10 = pnand %p1167_p9, %p1164_p8 }
  0x1c   :  { %1172 = shalt.err (!%p1169_p10)
}
  0x1d   :  { %s1173_s25 = scalar_lea.vmem %s39_s17, 8192  ;;  %p1178_p12 = scmp.lt.s32.totalorder %s39_s17, %s39_s17 }
  0x1e   :  { %p1174_p11 = scmp.ne.s32.totalorder %s39_s17, %s1173_s25  ;;  %p1179_p13 = scmp.lt.s32.totalorder %s1173_s25, %s1173_s25 }
  0x20   :  { %p1180_p0 = por %p1179_p13, %p1178_p12 }
  0x22   :  { %p1181_p1 = pnand %p1180_p0, %p1174_p11 }
  0x24   :  { %1184 = shalt.err (!%p1181_p1)
}
  0x25   :  { %44 = dma.hbm_to_vmem [thread:$0]  %s1424_s3, 8192, %s39_s17, [#allocation7], %s1214_s12, %s1214_s12, %s1215_s13  }
  0x26   :  { %1207 = dma.done.wait [#allocation4], 8192  }
  0x27   :  { %1208 = vsyncadd [#allocation4], 4294959104 }
  0x28   :  { %1209 = dma.done.wait [#allocation7], 8192  }
  0x29   :  { %1210 = vsyncadd [#allocation7], 4294959104  ;;  %v81_v1 = vld [vmem:[#allocation3 + $0x80] sm:$0xff]  ;;  %v82_v2 = vld [vmem:[#allocation3 + $0x88] sm:$0xff]  ;;  %vm621_vm0 = vcmask 7168  }
  0x2a   :  { %v65_v3 = vld [vmem:[#allocation3] sm:$0xff]  ;;  %v955_v4 = vpack.c.bf16 %v82_v2, %v81_v1  ;;  %v66_v5 = vld [vmem:[#allocation3 + $0x8] sm:$0xff]  ;;  %v83_v12 = vld [vmem:[#allocation3 + $0x90] sm:$0xff] }
  0x2b   :  { %v113_v6 = vld [vmem:[#allocation3 + $0x180] sm:$0xff]  ;;  %v114_v7 = vld [vmem:[#allocation3 + $0x188] sm:$0xff]  ;;  %v957_v8 = vpack.c.bf16 %v66_v5, %v65_v3  ;;  %v84_v14 = vld [vmem:[#allocation3 + $0x98] sm:$0xff] }
  0x2c   :  { %v987_v9 = vpack.c.bf16 %v114_v7, %v113_v6  ;;  %v97_v10 = vld [vmem:[#allocation3 + $0x100] sm:$0xff]  ;;  %v98_v11 = vld [vmem:[#allocation3 + $0x108] sm:$0xff]  ;;  %956 = vmatprep.subr.bf16.mxu0 %v955_v4  ;;  %v67_v15 = vld [vmem:[#allocation3 + $0x10] sm:$0xff]  ;;  %v959_v17 = vpack.c.bf16 %v84_v14, %v83_v12 }
  0x2d   :  { %v989_v13 = vpack.c.bf16 %v98_v11, %v97_v10  ;;  %v68_v16 = vld [vmem:[#allocation3 + $0x18] sm:$0xff]  ;;  %958 = vmatpush3.bf16.msra.mxu0 %v957_v8  ;;  %v115_v19 = vld [vmem:[#allocation3 + $0x190] sm:$0xff]  ;;  %v85_v24 = vld [vmem:[#allocation3 + $0xa0] sm:$0xff] }
  0x2e   :  { %988 = vmatprep.subr.bf16.mxu1 %v987_v9  ;;  %v961_v18 = vpack.c.bf16 %v68_v16, %v67_v15  ;;  %v116_v20 = vld [vmem:[#allocation3 + $0x198] sm:$0xff]  ;;  %v99_v21 = vld [vmem:[#allocation3 + $0x110] sm:$0xff]  ;;  %v86_v25 = vld [vmem:[#allocation3 + $0xa8] sm:$0xff]  ;;  %960 = vmatprep.subr.bf16.mxu0 %v959_v17 }
  0x2f   :  { %990 = vmatpush3.bf16.msra.mxu1 %v989_v13  ;;  %v991_v22 = vpack.c.bf16 %v116_v20, %v115_v19  ;;  %v100_v23 = vld [vmem:[#allocation3 + $0x118] sm:$0xff]  ;;  %v963_v27 = vpack.c.bf16 %v86_v25, %v85_v24  ;;  %v69_v28 = vld [vmem:[#allocation3 + $0x20] sm:$0xff]  ;;  %v70_v29 = vld [vmem:[#allocation3 + $0x28] sm:$0xff] }
  0x30   :  { %v993_v26 = vpack.c.bf16 %v100_v23, %v99_v21  ;;  %v117_v30 = vld [vmem:[#allocation3 + $0x1a0] sm:$0xff]  ;;  %v118_v31 = vld [vmem:[#allocation3 + $0x1a8] sm:$0xff]  ;;  %v965_v34 = vpack.c.bf16 %v70_v29, %v69_v28  ;;  %v87_v36 = vld [vmem:[#allocation3 + $0xb0] sm:$0xff] }
  0x31   :  { %992 = vmatprep.subr.bf16.mxu1 %v991_v22  ;;  %v101_v32 = vld [vmem:[#allocation3 + $0x120] sm:$0xff]  ;;  %v102_v33 = vld [vmem:[#allocation3 + $0x128] sm:$0xff]  ;;  %962 = vmatpush3.bf16.msra.mxu0 %v961_v18  ;;  %v995_v35 = vpack.c.bf16 %v118_v31, %v117_v30  ;;  %v88_v37 = vld [vmem:[#allocation3 + $0xb8] sm:$0xff] }
  0x32   :  { %v71_v38 = vld [vmem:[#allocation3 + $0x30] sm:$0xff]  ;;  %964 = vmatprep.subr.bf16.mxu0 %v963_v27  ;;  %v997_v39 = vpack.c.bf16 %v102_v33, %v101_v32  ;;  %v967_v40 = vpack.c.bf16 %v88_v37, %v87_v36  ;;  %v72_v41 = vld [vmem:[#allocation3 + $0x38] sm:$0xff]  ;;  %v89_v47 = vld [vmem:[#allocation3 + $0xc0] sm:$0xff] }
  0x33   :  { %994 = vmatpush3.bf16.msra.mxu1 %v993_v26  ;;  %v119_v42 = vld [vmem:[#allocation3 + $0x1b0] sm:$0xff]  ;;  %v120_v43 = vld [vmem:[#allocation3 + $0x1b8] sm:$0xff]  ;;  %v90_v48 = vld [vmem:[#allocation3 + $0xc8] sm:$0xff]  ;;  %v969_v49 = vpack.c.bf16 %v72_v41, %v71_v38 }
  0x34   :  { %996 = vmatprep.subr.bf16.mxu1 %v995_v35  ;;  %v999_v44 = vpack.c.bf16 %v120_v43, %v119_v42  ;;  %v103_v45 = vld [vmem:[#allocation3 + $0x130] sm:$0xff]  ;;  %v104_v46 = vld [vmem:[#allocation3 + $0x138] sm:$0xff]  ;;  %v121_v50 = vld [vmem:[#allocation3 + $0x1c0] sm:$0xff]  ;;  %v971_v53 = vpack.c.bf16 %v90_v48, %v89_v47 }
  0x35   :  { %966 = vmatpush3.bf16.msra.mxu0 %v965_v34  ;;  %v122_v51 = vld [vmem:[#allocation3 + $0x1c8] sm:$0xff]  ;;  %v1001_v52 = vpack.c.bf16 %v104_v46, %v103_v45  ;;  %v73_v54 = vld [vmem:[#allocation3 + $0x40] sm:$0xff]  ;;  %v91_v59 = vld [vmem:[#allocation3 + $0xd0] sm:$0xff] }
  0x36   :  { %968 = vmatprep.subr.bf16.mxu0 %v967_v40  ;;  %v74_v55 = vld [vmem:[#allocation3 + $0x48] sm:$0xff]  ;;  %v105_v56 = vld [vmem:[#allocation3 + $0x140] sm:$0xff]  ;;  %v1003_v57 = vpack.c.bf16 %v122_v51, %v121_v50  ;;  %v92_v60 = vld [vmem:[#allocation3 + $0xd8] sm:$0xff] }
  0x37   :  { %998 = vmatpush3.bf16.msra.mxu1 %v997_v39  ;;  %v106_v58 = vld [vmem:[#allocation3 + $0x148] sm:$0xff]  ;;  %v123_v61 = vld [vmem:[#allocation3 + $0x1d0] sm:$0xff]  ;;  %v124_v62 = vld [vmem:[#allocation3 + $0x1d8] sm:$0xff]  ;;  %v973_v63 = vpack.c.bf16 %v74_v55, %v73_v54  ;;  %v975_v1 = vpack.c.bf16 %v92_v60, %v91_v59 }
  0x38   :  { %1000 = vmatprep.subr.bf16.mxu1 %v999_v44  ;;  %v1005_v0 = vpack.c.bf16 %v106_v58, %v105_v56  ;;  %v75_v2 = vld [vmem:[#allocation3 + $0x50] sm:$0xff]  ;;  %v76_v3 = vld [vmem:[#allocation3 + $0x58] sm:$0xff]  ;;  %v1007_v5 = vpack.c.bf16 %v124_v62, %v123_v61  ;;  %v93_v7 = vld [vmem:[#allocation3 + $0xe0] sm:$0xff] }
  0x39   :  { %970 = vmatpush3.bf16.msra.mxu0 %v969_v49  ;;  %v107_v4 = vld [vmem:[#allocation3 + $0x150] sm:$0xff]  ;;  %v108_v6 = vld [vmem:[#allocation3 + $0x158] sm:$0xff]  ;;  %v94_v8 = vld [vmem:[#allocation3 + $0xe8] sm:$0xff]  ;;  %v977_v11 = vpack.c.bf16 %v76_v3, %v75_v2 }
  0x3a   :  { %972 = vmatprep.subr.bf16.mxu0 %v971_v53  ;;  %v125_v9 = vld [vmem:[#allocation3 + $0x1e0] sm:$0xff]  ;;  %v126_v10 = vld [vmem:[#allocation3 + $0x1e8] sm:$0xff]  ;;  %v1009_v14 = vpack.c.bf16 %v108_v6, %v107_v4  ;;  %v979_v15 = vpack.c.bf16 %v94_v8, %v93_v7  ;;  %v95_v20 = vld [vmem:[#allocation3 + $0xf0] sm:$0xff] }
  0x3b   :  { %1002 = vmatpush3.bf16.msra.mxu1 %v1001_v52  ;;  %v77_v12 = vld [vmem:[#allocation3 + $0x60] sm:$0xff]  ;;  %v78_v13 = vld [vmem:[#allocation3 + $0x68] sm:$0xff]  ;;  %v1011_v19 = vpack.c.bf16 %v126_v10, %v125_v9  ;;  %v96_v21 = vld [vmem:[#allocation3 + $0xf8] sm:$0xff] }
  0x3c   :  { %1004 = vmatprep.subr.bf16.mxu1 %v1003_v57  ;;  %v109_v16 = vld [vmem:[#allocation3 + $0x160] sm:$0xff]  ;;  %v110_v17 = vld [vmem:[#allocation3 + $0x168] sm:$0xff]  ;;  %v1296_v22 = vld [vmem:[%s1421_s0 + $0x18] sm:$0xff]  ;;  %v981_v25 = vpack.c.bf16 %v78_v13, %v77_v12  ;;  %v983_v27 = vpack.c.bf16 %v96_v21, %v95_v20 }
  0x3d   :  { %974 = vmatpush3.bf16.msra.mxu0 %v973_v63  ;;  %v1290_v18 = vld [vmem:[%s1421_s0 + $0x8] sm:$0xff]  ;;  %v127_v23 = vld [vmem:[#allocation3 + $0x1f0] sm:$0xff]  ;;  %v128_v24 = vld [vmem:[#allocation3 + $0x1f8] sm:$0xff]  ;;  %275 = vmatprep.mubr.f32.mxu1 %v1296_v22  ;;  %v1013_v26 = vpack.c.bf16 %v110_v17, %v109_v16 }
  0x3e   :  { %976 = vmatprep.subr.bf16.mxu0 %v975_v1  ;;  %200 = vmatprep.mubr.f32.mxu0 %v1290_v18  ;;  %v79_v28 = vld [vmem:[#allocation3 + $0x70] sm:$0xff]  ;;  %v80_v29 = vld [vmem:[#allocation3 + $0x78] sm:$0xff]  ;;  %v1015_v31 = vpack.c.bf16 %v128_v24, %v127_v23  ;;  %v304_v33 = vld [vmem:[#allocation6 + $0x80] sm:$0xff] }
  0x3f   :  { %1006 = vmatpush3.bf16.msra.mxu1 %v1005_v0  ;;  %v111_v30 = vld [vmem:[#allocation3 + $0x170] sm:$0xff]  ;;  %v112_v32 = vld [vmem:[#allocation3 + $0x178] sm:$0xff]  ;;  %v305_v34 = vld [vmem:[#allocation6 + $0x88] sm:$0xff]  ;;  %v985_v37 = vpack.c.bf16 %v80_v29, %v79_v28 }
  0x40   :  { %1008 = vmatprep.subr.bf16.mxu1 %v1007_v5  ;;  %v336_v35 = vld [vmem:[#allocation6 + $0x180] sm:$0xff]  ;;  %v337_v36 = vld [vmem:[#allocation6 + $0x188] sm:$0xff]  ;;  %v1017_v38 = vpack.c.bf16 %v112_v32, %v111_v30  ;;  %v1019_v39 = vpack.c.bf16 %v305_v34, %v304_v33  ;;  %v306_v45 = vld [vmem:[#allocation6 + $0x90] sm:$0xff] }
  0x41   :  { %978 = vmatpush3.bf16.msra.mxu0 %v977_v11  ;;  %v288_v40 = vld [vmem:[#allocation6] sm:$0xff]  ;;  %v289_v41 = vld [vmem:[#allocation6 + $0x8] sm:$0xff]  ;;  %v1051_v43 = vpack.c.bf16 %v337_v36, %v336_v35  ;;  %v307_v46 = vld [vmem:[#allocation6 + $0x98] sm:$0xff] }
  0x42   :  { %980 = vmatprep.subr.bf16.mxu0 %v979_v15  ;;  %v320_v42 = vld [vmem:[#allocation6 + $0x100] sm:$0xff]  ;;  %v321_v44 = vld [vmem:[#allocation6 + $0x108] sm:$0xff]  ;;  %v338_v47 = vld [vmem:[#allocation6 + $0x190] sm:$0xff]  ;;  %v1021_v50 = vpack.c.bf16 %v289_v41, %v288_v40  ;;  %v1023_v53 = vpack.c.bf16 %v307_v46, %v306_v45 }
  0x43   :  { %1010 = vmatpush3.bf16.msra.mxu1 %v1009_v14  ;;  %v339_v48 = vld [vmem:[#allocation6 + $0x198] sm:$0xff]  ;;  %v1307_v51 = vld [vmem:[%s1421_s0 + $0x10] sm:$0xff]  ;;  %v1053_v52 = vpack.c.bf16 %v321_v44, %v320_v42  ;;  %v308_v59 = vld [vmem:[#allocation6 + $0xa0] sm:$0xff] }
  0x44   :  { %1012 = vmatprep.subr.bf16.mxu1 %v1011_v19  ;;  %v1302_v49 = vld [vmem:[%s1421_s0] sm:$0xff]  ;;  %v290_v54 = vld [vmem:[#allocation6 + $0x10] sm:$0xff]  ;;  %v1055_v57 = vpack.c.bf16 %v339_v48, %v338_v47  ;;  %v309_v60 = vld [vmem:[#allocation6 + $0xa8] sm:$0xff] }
  0x45   :  { %982 = vmatpush3.bf16.msra.mxu0 %v981_v25  ;;  %v291_v55 = vld [vmem:[#allocation6 + $0x18] sm:$0xff]  ;;  %v322_v56 = vld [vmem:[#allocation6 + $0x110] sm:$0xff]  ;;  %v340_v61 = vld [vmem:[#allocation6 + $0x1a0] sm:$0xff]  ;;  %v1027_v1 = vpack.c.bf16 %v309_v60, %v308_v59 }
  0x46   :  { %984 = vmatprep.subr.bf16.mxu0 %v983_v27  ;;  %v323_v58 = vld [vmem:[#allocation6 + $0x118] sm:$0xff]  ;;  %v341_v62 = vld [vmem:[#allocation6 + $0x1a8] sm:$0xff]  ;;  %v1025_v63 = vpack.c.bf16 %v291_v55, %v290_v54  ;;  %v292_v2 = vld [vmem:[#allocation6 + $0x20] sm:$0xff] }
  0x47   :  { %1014 = vmatpush3.bf16.msra.mxu1 %v1013_v26  ;;  %v1057_v0 = vpack.c.bf16 %v323_v58, %v322_v56  ;;  %v293_v3 = vld [vmem:[#allocation6 + $0x28] sm:$0xff]  ;;  %v324_v4 = vld [vmem:[#allocation6 + $0x120] sm:$0xff]  ;;  %v1059_v5 = vpack.c.bf16 %v341_v62, %v340_v61  ;;  %v310_v7 = vld [vmem:[#allocation6 + $0xb0] sm:$0xff] }
  0x48   :  { %1016 = vmatprep.subr.bf16.mxu1 %v1015_v31  ;;  %v325_v6 = vld [vmem:[#allocation6 + $0x128] sm:$0xff]  ;;  %v311_v8 = vld [vmem:[#allocation6 + $0xb8] sm:$0xff]  ;;  %v342_v9 = vld [vmem:[#allocation6 + $0x1b0] sm:$0xff]  ;;  %v1029_v11 = vpack.c.bf16 %v293_v3, %v292_v2 }
  0x49   :  { %986 = vmatpush3.bf16.msra.mxu0 %v985_v37  ;;  %v343_v10 = vld [vmem:[#allocation6 + $0x1b8] sm:$0xff]  ;;  %v294_v12 = vld [vmem:[#allocation6 + $0x30] sm:$0xff]  ;;  %v1314_v14 = vld [vmem:[%s1421_s0 + $0x28] sm:$0xff]  ;;  %v1061_v15 = vpack.c.bf16 %v325_v6, %v324_v4  ;;  %v1031_v16 = vpack.c.bf16 %v311_v8, %v310_v7 }
  0x4a   :  { %1020 = vmatprep.subr.bf16.mxu0 %v1019_v39  ;;  %v295_v13 = vld [vmem:[#allocation6 + $0x38] sm:$0xff]  ;;  %v326_v17 = vld [vmem:[#allocation6 + $0x130] sm:$0xff]  ;;  %v1063_v21 = vpack.c.bf16 %v343_v10, %v342_v9  ;;  %v312_v23 = vld [vmem:[#allocation6 + $0xc0] sm:$0xff] }
  0x4b   :  { %1018 = vmatpush3.bf16.msra.mxu1 %v1017_v38  ;;  %v327_v19 = vld [vmem:[#allocation6 + $0x138] sm:$0xff]  ;;  %v313_v24 = vld [vmem:[#allocation6 + $0xc8] sm:$0xff]  ;;  %v344_v26 = vld [vmem:[#allocation6 + $0x1c0] sm:$0xff]  ;;  %v1033_v29 = vpack.c.bf16 %v295_v13, %v294_v12 }
  0x4c   :  { %1052 = vmatprep.subr.bf16.mxu1 %v1051_v43  ;;  %201 = vmatmul.mubr.f32.vlgmr.msra.gmra.mrb[0].mxu0 %v1302_v49  ;;  %v1319_v20 = vld [vmem:[%s1421_s0 + $0x20] sm:$0xff]  ;;  %v1325_v25 = vld [vmem:[%s1421_s0 + $0x38] sm:$0xff]  ;;  %v345_v27 = vld [vmem:[#allocation6 + $0x1c8] sm:$0xff]  ;;  %v1065_v30 = vpack.c.bf16 %v327_v19, %v326_v17  ;;  %v1035_v31 = vpack.c.bf16 %v313_v24, %v312_v23 }
  0x4d   :  { %1022 = vmatpush3.bf16.msra.mxu0 %v1021_v50  ;;  %205 = vmatprep.mubr.f32.mxu0 %v1314_v14  ;;  %v1332_v28 = vld [vmem:[%s1421_s0 + $0x30] sm:$0xff]  ;;  %v296_v32 = vld [vmem:[#allocation6 + $0x40] sm:$0xff]  ;;  %v1067_v35 = vpack.c.bf16 %v345_v27, %v344_v26  ;;  %v315_v38 = vld [vmem:[#allocation6 + $0xd8] sm:$0xff] }
  0x4e   :  { %276 = vmatmul.mubr.f32.vlgmr.msra.gmra.mrb[0].mxu1 %v1307_v51  ;;  %1024 = vmatprep.subr.bf16.mxu0 %v1023_v53  ;;  %v297_v33 = vld [vmem:[#allocation6 + $0x48] sm:$0xff]  ;;  %v328_v34 = vld [vmem:[#allocation6 + $0x140] sm:$0xff]  ;;  %v314_v37 = vld [vmem:[#allocation6 + $0xd0] sm:$0xff] }
  0x4f   :  { %1054 = vmatpush3.bf16.msra.mxu1 %v1053_v52  ;;  %280 = vmatprep.mubr.f32.mxu1 %v1325_v25  ;;  %v329_v36 = vld [vmem:[#allocation6 + $0x148] sm:$0xff]  ;;  %v346_v39 = vld [vmem:[#allocation6 + $0x1d0] sm:$0xff]  ;;  %v347_v40 = vld [vmem:[#allocation6 + $0x1d8] sm:$0xff]  ;;  %v1037_v41 = vpack.c.bf16 %v297_v33, %v296_v32  ;;  %v1039_v43 = vpack.c.bf16 %v315_v38, %v314_v37 }
  0x50   :  { %1056 = vmatprep.subr.bf16.mxu1 %v1055_v57  ;;  %206 = vmatmul.mubr.f32.gmra.mrb[2].mxu0 %v1319_v20  ;;  %v1069_v42 = vpack.c.bf16 %v329_v36, %v328_v34  ;;  %v298_v44 = vld [vmem:[#allocation6 + $0x50] sm:$0xff]  ;;  %v299_v45 = vld [vmem:[#allocation6 + $0x58] sm:$0xff]  ;;  %v1071_v47 = vpack.c.bf16 %v347_v40, %v346_v39  ;;  %v316_v50 = vld [vmem:[#allocation6 + $0xe0] sm:$0xff] }
  0x51   :  { %1026 = vmatpush3.bf16.msra.mxu0 %v1025_v63  ;;  %423 = vmatprep.mubr.f32.mxu0 %v1290_v18  ;;  %v330_v46 = vld [vmem:[#allocation6 + $0x150] sm:$0xff]  ;;  %v331_v48 = vld [vmem:[#allocation6 + $0x158] sm:$0xff]  ;;  %v317_v52 = vld [vmem:[#allocation6 + $0xe8] sm:$0xff]  ;;  %v1041_v55 = vpack.c.bf16 %v299_v45, %v298_v44 }
  0x52   :  { %1028 = vmatprep.subr.bf16.mxu0 %v1027_v1  ;;  %281 = vmatmul.mubr.f32.gmra.mrb[2].mxu1 %v1332_v28  ;;  %v348_v53 = vld [vmem:[#allocation6 + $0x1e0] sm:$0xff]  ;;  %v349_v54 = vld [vmem:[#allocation6 + $0x1e8] sm:$0xff]  ;;  %v1073_v56 = vpack.c.bf16 %v331_v48, %v330_v46  ;;  %v1043_v57 = vpack.c.bf16 %v317_v52, %v316_v50  ;;  %v318_v63 = vld [vmem:[#allocation6 + $0xf0] sm:$0xff] }
  0x53   :  { %1058 = vmatpush3.bf16.msra.mxu1 %v1057_v0  ;;  %498 = vmatprep.mubr.f32.mxu1 %v1296_v22  ;;  %v300_v58 = vld [vmem:[#allocation6 + $0x60] sm:$0xff]  ;;  %v301_v59 = vld [vmem:[#allocation6 + $0x68] sm:$0xff]  ;;  %v1075_v61 = vpack.c.bf16 %v349_v54, %v348_v53  ;;  %v319_v0 = vld [vmem:[#allocation6 + $0xf8] sm:$0xff] }
  0x54   :  { %1060 = vmatprep.subr.bf16.mxu1 %v1059_v5  ;;  %v332_v60 = vld [vmem:[#allocation6 + $0x160] sm:$0xff]  ;;  %v333_v62 = vld [vmem:[#allocation6 + $0x168] sm:$0xff]  ;;  %v350_v1 = vld [vmem:[#allocation6 + $0x1f0] sm:$0xff]  ;;  %v1045_v3 = vpack.c.bf16 %v301_v59, %v300_v58  ;;  %v1047_v5 = vpack.c.bf16 %v319_v0, %v318_v63 }
  0x55   :  { %1030 = vmatpush3.bf16.msra.mxu0 %v1029_v11  ;;  %v351_v2 = vld [vmem:[#allocation6 + $0x1f8] sm:$0xff]  ;;  %v1077_v4 = vpack.c.bf16 %v333_v62, %v332_v60  ;;  %v302_v6 = vld [vmem:[#allocation6 + $0x70] sm:$0xff]  ;;  %v528_v24 = vld [vmem:[%s1426_s5 + $0x28] sm:$0xff] }
  0x56   :  { %1032 = vmatprep.subr.bf16.mxu0 %v1031_v16  ;;  %v303_v7 = vld [vmem:[#allocation6 + $0x78] sm:$0xff]  ;;  %v1079_v8 = vpack.c.bf16 %v351_v2, %v350_v1  ;;  %v334_v9 = vld [vmem:[#allocation6 + $0x170] sm:$0xff]  ;;  %v532_v32 = vld [vmem:[%s1426_s5 + $0x48] sm:$0xff] }
  0x57   :  { %1062 = vmatpush3.bf16.msra.mxu1 %v1061_v15  ;;  %v335_v10 = vld [vmem:[#allocation6 + $0x178] sm:$0xff]  ;;  %v1049_v11 = vpack.c.bf16 %v303_v7, %v302_v6  ;;  %v524_v15 = vld [vmem:[%s1426_s5 + $0x8] sm:$0xff]  ;;  %v525_v17 = vld [vmem:[%s1426_s5 + $0x10] sm:$0xff] }
  0x58   :  { %1064 = vmatprep.subr.bf16.mxu1 %v1063_v21  ;;  %v1081_v12 = vpack.c.bf16 %v335_v10, %v334_v9  ;;  %v523_v13 = vld [vmem:[%s1426_s5] sm:$0xff]  ;;  %v526_v19 = vld [vmem:[%s1426_s5 + $0x18] sm:$0xff]  ;;  %v529_v27 = vld [vmem:[%s1426_s5 + $0x30] sm:$0xff] }
  0x59   :  { %1034 = vmatpush3.bf16.msra.mxu0 %v1033_v29  ;;  %v1083_v16 = vpack.c.bf16 %v524_v15, %v523_v13  ;;  %v1087_v21 = vpack.c.bf16 %v526_v19, %v525_v17  ;;  %v527_v23 = vld [vmem:[%s1426_s5 + $0x20] sm:$0xff]  ;;  %v530_v29 = vld [vmem:[%s1426_s5 + $0x38] sm:$0xff]  ;;  %v533_v34 = vld [vmem:[%s1426_s5 + $0x50] sm:$0xff] }
  0x5a   :  { %1036 = vmatprep.subr.bf16.mxu0 %v1035_v31  ;;  %v1091_v26 = vpack.c.bf16 %v528_v24, %v527_v23  ;;  %v531_v31 = vld [vmem:[%s1426_s5 + $0x40] sm:$0xff]  ;;  %v536_v38 = vld [vmem:[%s1426_s5 + $0x68] sm:$0xff]  ;;  %v537_v39 = vld [vmem:[%s1426_s5 + $0x70] sm:$0xff] }
  0x5b   :  { %1066 = vmatpush3.bf16.msra.mxu1 %v1065_v30  ;;  %v1095_v30 = vpack.c.bf16 %v530_v29, %v529_v27  ;;  %v1099_v33 = vpack.c.bf16 %v532_v32, %v531_v31  ;;  %v535_v37 = vld [vmem:[%s1426_s5 + $0x60] sm:$0xff] }
  0x5c   :  { %1068 = vmatprep.subr.bf16.mxu1 %v1067_v35  ;;  %v534_v35 = vld [vmem:[%s1426_s5 + $0x58] sm:$0xff]  ;;  %v1107_v40 = vpack.c.bf16 %v536_v38, %v535_v37  ;;  %v745_v44 = vld [vmem:[%s1423_s2] ss:$0 sm:$0xff]  ;;  %s1219_s2 = smov [#allocation8]  }
  0x5d   :  { %1038 = vmatpush3.bf16.msra.mxu0 %v1037_v41  ;;  %v1103_v36 = vpack.c.bf16 %v534_v35, %v533_v34  ;;  %v538_v41 = vld [vmem:[%s1426_s5 + $0x78] sm:$0xff]  ;;  %v746_v63 = vld [vmem:[%s1425_s4] ss:$0 sm:$0xff]  ;;  %s735_s4 = sshll.u32 %s1219_s2, 4  ;;  %s736_s4 = int_to_ptr.vmem [resolvable:$true] %s735_s4 }
  0x5e   :  { %1040 = vmatprep.subr.bf16.mxu0 %v1039_v43  ;;  %v749_v34 = vld [vmem:[#allocation2] ss:$0 sm:$0xff]  ;;  %s1185_s25 = scalar_lea.vmem %s736_s4, 64  ;;  %p1190_p3 = scmp.lt.s32.totalorder %s736_s4, %s736_s4 }
  0x5f   :  { %1070 = vmatpush3.bf16.msra.mxu1 %v1069_v42  ;;  %v1111_v42 = vpack.c.bf16 %v538_v41, %v537_v39  ;;  %p1186_p2 = scmp.ne.s32.totalorder %s736_s4, %s1185_s25  ;;  %p1191_p4 = scmp.lt.s32.totalorder %s1185_s25, %s1185_s25 }
  0x60   :  { %1072 = vmatprep.subr.bf16.mxu1 %v1071_v47 }
  0x61   :  { %1042 = vmatpush3.bf16.msra.mxu0 %v1041_v55  ;;  %p1192_p5 = por %p1191_p4, %p1190_p3 }
  0x62   :  { %1044 = vmatprep.subr.bf16.mxu0 %v1043_v57 }
  0x63   :  { %1074 = vmatpush3.bf16.msra.mxu1 %v1073_v56  ;;  %p1193_p6 = pnand %p1192_p5, %p1186_p2 }
  0x64   :  { %1076 = vmatprep.subr.bf16.mxu1 %v1075_v61 }
  0x65   :  { %1046 = vmatpush3.bf16.msra.mxu0 %v1045_v3 }
  0x66   :  { %1048 = vmatprep.subr.bf16.mxu0 %v1047_v5 }
  0x67   :  { %1078 = vmatpush3.bf16.msra.mxu1 %v1077_v4 }
  0x68   :  { %1080 = vmatprep.subr.bf16.mxu1 %v1079_v8 }
  0x69   :  { %1050 = vmatpush3.bf16.msra.mxu0 %v1049_v11 }
  0x6a   :  { %1084 = vmatprep.subr.bf16.mxu0 %v1083_v16 }
  0x6b   :  { %1082 = vmatpush3.bf16.msra.mxu1 %v1081_v12 }
  0x6c   :  { %424 = vmatmul.mubr.f32.vlgmr.msra.gmra.mrb[4].mxu0 %v1302_v49 }
  0x6d   :  { %428 = vmatprep.mubr.f32.mxu0 %v1314_v14  ;;  %1086 = vmatpush3.bf16.msra.mxu0 %v1083_v16 }
  0x6e   :  { %499 = vmatmul.mubr.f32.vlgmr.msra.gmra.mrb[4].mxu1 %v1307_v51  ;;  %1088 = vmatprep.subr.bf16.mxu0 %v1087_v21 }
  0x6f   :  { %503 = vmatprep.mubr.f32.mxu1 %v1325_v25 }
  0x70   :  { %429 = vmatmul.mubr.f32.gmra.mrb[6].mxu0 %v1319_v20 }
  0x71   :  { %1090 = vmatpush3.bf16.msra.mxu0 %v1087_v21 }
  0x72   :  { %504 = vmatmul.mubr.f32.gmra.mrb[6].mxu1 %v1332_v28  ;;  %1092 = vmatprep.subr.bf16.mxu0 %v1091_v26 }
  0x75   :  { %1094 = vmatpush3.bf16.msra.mxu0 %v1091_v26 }
  0x76   :  { %1096 = vmatprep.subr.bf16.mxu0 %v1095_v30 }
  0x79   :  { %1098 = vmatpush3.bf16.msra.mxu0 %v1095_v30 }
  0x7a   :  { %1100 = vmatprep.subr.bf16.mxu0 %v1099_v33 }
  0x7d   :  { %1102 = vmatpush3.bf16.msra.mxu0 %v1099_v33  ;;  %v1217_v33 = vmov 0  }
  0x7e   :  { %1104 = vmatprep.subr.bf16.mxu0 %v1103_v36  ;;  %1122 = vset.pattern.permute.xlu0 %v1217_v33 }
  0x81   :  { %1106 = vmatpush3.bf16.msra.mxu0 %v1103_v36 }
  0x82   :  { %1108 = vmatprep.subr.bf16.mxu0 %v1107_v40 }
  0x85   :  { %1110 = vmatpush3.bf16.msra.mxu0 %v1107_v40 }
  0x86   :  { %1112 = vmatprep.subr.bf16.mxu0 %v1111_v42 }
  0x89   :  { %1114 = vmatpush3.bf16.msra.mxu0 %v1111_v42 }
 0x11f   :  { %v782_v43 = vpop.f32.mrb[0].mxu0 }
 0x120   :  { %v783_v45 = vpop.f32.mrb[1].mxu0 }
 0x121   :  { %v820_v46 = vpop.f32.mrb[0].mxu1  ;;  %v784_v47 = vadd.f32 %v783_v45, %v782_v43 }
 0x122   :  { %v821_v48 = vpop.f32.mrb[1].mxu1 }
 0x123   :  { %v822_v50 = vadd.f32 %v821_v48, %v820_v46  ;;  %v203_v52 = vadd.f32 %v784_v47, %v745_v44  ;;  %v785_v54 = vpop.f32.mrb[2].mxu0 }
 0x124   :  { %v786_v55 = vpop.f32.mrb[3].mxu0 }
 0x125   :  { %v278_v53 = vadd.f32 %v822_v50, %v203_v52  ;;  %v823_v56 = vpop.f32.mrb[2].mxu1  ;;  %v787_v57 = vadd.f32 %v786_v55, %v785_v54 }
 0x126   :  { %v824_v58 = vpop.f32.mrb[3].mxu1 }
 0x127   :  { %v825_v59 = vadd.f32 %v824_v58, %v823_v56  ;;  %v208_v60 = vadd.f32 %v787_v57, %v745_v44 }
 0x129   :  { %v283_v61 = vadd.f32 %v825_v59, %v208_v60 }
 0x13f   :  { %v858_v62 = vpop.f32.mrb[4].mxu0 }
 0x140   :  { %v859_v0 = vpop.f32.mrb[5].mxu0 }
 0x141   :  { %v896_v1 = vpop.f32.mrb[4].mxu1  ;;  %v860_v2 = vadd.f32 %v859_v0, %v858_v62 }
 0x142   :  { %v897_v3 = vpop.f32.mrb[5].mxu1 }
 0x143   :  { %v898_v4 = vadd.f32 %v897_v3, %v896_v1  ;;  %v426_v5 = vadd.f32 %v860_v2, %v746_v63  ;;  %v861_v6 = vpop.f32.mrb[6].mxu0 }
 0x144   :  { %v862_v7 = vpop.f32.mrb[7].mxu0 }
 0x145   :  { %v899_v8 = vpop.f32.mrb[6].mxu1  ;;  %v501_v9 = vadd.f32 %v898_v4, %v426_v5  ;;  %v863_v10 = vadd.f32 %v862_v7, %v861_v6 }
 0x146   :  { %v900_v11 = vpop.f32.mrb[7].mxu1 }
 0x147   :  { %v901_v12 = vadd.f32 %v900_v11, %v899_v8  ;;  %v747_v13 = vmul.f32 -1.442695, %v501_v9  ;;  %v431_v15 = vadd.f32 %v863_v10, %v746_v63 }
 0x149   :  { %1123 = vpow2.f32 %v747_v13  ;;  %v506_v16 = vadd.f32 %v901_v12, %v431_v15 }
 0x14b   :  { %v748_v17 = vmul.f32 -1.442695, %v506_v16 }
 0x14d   :  { %1125 = vpow2.f32 %v748_v17 }
 0x14e   :  { %1127 = vtanh.f32 %v278_v53 }
 0x153   :  { %v1124_v19 = vpop.eup %1123 }
 0x154   :  { %v515_v21 = vadd.f32 1.0, %v1124_v19 }
 0x156   :  { %1129 = vrcp.f32 %v515_v21 }
 0x157   :  { %v1126_v23 = vpop.eup %1125  ;;  %1131 = vtanh.f32 %v283_v61 }
 0x158   :  { %v516_v24 = vadd.f32 1.0, %v1126_v23  ;;  %v1128_v26 = vpop.eup %1127 }
 0x15a   :  { %1133 = vrcp.f32 %v516_v24 }
 0x160   :  { %v1130_v27 = vpop.eup %1129 }
 0x161   :  { %v521_v29 = vmul.f32 %v1130_v27, %v1128_v26  ;;  %v1132_v30 = vpop.eup %1131 }
 0x163   :  { %952 = vmatprep.mubr.f32.mxu0 %v521_v29 }
 0x164   :  { %v1134_v31 = vpop.eup %1133 }
 0x165   :  { %v522_v32 = vmul.f32 %v1134_v31, %v1132_v30 }
 0x167   :  { %953 = vmatmul.mubr.f32.vlgmr.msra.gmra.mrb[8].mxu0 %v522_v32 }
 0x23a   :  { %v954_v35 = vpop.f32.mrb[8].mxu0 }
 0x23b   :  { %v618_v36 = vadd.f32 %v954_v35, %v749_v34  ;;  %v612_v37 = vpop.f32.mrb[9].mxu0 }
 0x23c   :  { %v613_v38 = vadd.f32 %v749_v34, %v612_v37 }
 0x23d   :  { %v623_v39 = vsel %vm621_vm0, %v618_v36, -inf }
 0x23e   :  { %v622_v40 = vsel %vm621_vm0, %v613_v38, -inf }
 0x23f   :  { %v624_v41 = vmax.f32 %v622_v40, %v623_v39 }
 0x241   :  { %v625_v42 = vrot.slane %v624_v41, 4 }
 0x243   :  { %v626_v43 = vmax.f32 %v624_v41, %v625_v42 }
 0x245   :  { %v627_v44 = vrot.slane %v626_v43, 2 }
 0x247   :  { %v628_v45 = vmax.f32 %v626_v43, %v627_v44 }
 0x249   :  { %v629_v46 = vrot.slane %v628_v45, 1 }
 0x24b   :  { %v630_v47 = vmax.f32 %v628_v45, %v629_v46 }
 0x24d   :  { %v631_v48 = vsub.f32 %v613_v38, %v630_v47  ;;  %v632_v50 = vsub.f32 %v618_v36, %v630_v47 }
 0x24f   :  { %v633_v52 = vmul.f32 1.442695, %v631_v48  ;;  %v635_v53 = vmul.f32 1.442695, %v632_v50 }
 0x251   :  { %1135 = vpow2.f32 %v633_v52 }
 0x252   :  { %1137 = vpow2.f32 %v635_v53 }
 0x25b   :  { %v1136_v54 = vpop.eup %1135 }
 0x25c   :  { %v1138_v55 = vpop.eup %1137  ;;  %v637_v56 = vsel %vm621_vm0, %v1136_v54, 0.0 }
 0x25d   :  { %v638_v57 = vsel %vm621_vm0, %v1138_v55, 0.0 }
 0x25e   :  { %v639_v58 = vadd.f32 %v638_v57, %v637_v56 }
 0x260   :  { %v640_v59 = vrot.slane %v639_v58, 4 }
 0x262   :  { %v641_v60 = vadd.f32 %v640_v59, %v639_v58 }
 0x264   :  { %v642_v61 = vrot.slane %v641_v60, 2 }
 0x266   :  { %v643_v62 = vadd.f32 %v642_v61, %v641_v60 }
 0x268   :  { %v644_v63 = vrot.slane %v643_v62, 1 }
 0x26a   :  { %v645_v0 = vadd.f32 %v644_v63, %v643_v62 }
 0x26c   :  { %1139 = vrcp.f32 %v645_v0 }
 0x276   :  { %v1140_v1 = vpop.eup %1139 }
 0x277   :  { %v647_v2 = vmul.f32 %v1140_v1, %v1136_v54  ;;  %v648_v3 = vmul.f32 %v1140_v1, %v1138_v55 }
 0x279   :  { %651 = vperm.xlu0 %1122, %v647_v2  }
 0x27d   :  { %656 = vperm.xlu0 %1122, %v648_v3  }
 0x2f8   :  { %v652_v4 = vpop.permute.xlu0 %651 }
 0x2f9   :  { %v659_v5 = vmul.f32 %v652_v4, %v1302_v49  ;;  %v660_v6 = vmul.f32 %v652_v4, %v1290_v18  ;;  %v661_v7 = vmul.f32 %v652_v4, %v1307_v51  ;;  %v662_v8 = vmul.f32 %v652_v4, %v1296_v22 }
 0x2fa   :  { %v1218_v51 = vmov 1966171168   ;;  %v704_v22 = vlaneseq }
 0x2fb   :  { %v702_v24 = vunpack.c.l.s4 %v1218_v51 }
 0x2fc   :  { %v657_v9 = vpop.permute.xlu0 %656  ;;  %v705_v32 = vshrl.u32 %v704_v22, 7  ;;  %vm726_vm1 = vcmp.lt.s32.totalorder %v704_v22, 512 }
 0x2fd   :  { %v663_v10 = vmul.f32 %v657_v9, %v1319_v20  ;;  %v664_v11 = vmul.f32 %v657_v9, %v1314_v14  ;;  %v665_v12 = vmul.f32 %v657_v9, %v1332_v28  ;;  %v666_v13 = vmul.f32 %v657_v9, %v1325_v25 }
 0x2fe   :  { %v703_v25 = vunpack.c.0.s8 %v702_v24 }
 0x2ff   :  { %v667_v15 = vadd.f32 %v663_v10, %v659_v5  ;;  %v674_v16 = vadd.f32 %v664_v11, %v660_v6  ;;  %v681_v17 = vadd.f32 %v665_v12, %v661_v7  ;;  %v688_v19 = vadd.f32 %v666_v13, %v662_v8 }
 0x300   :  { %v706_v41 = vsub.s32 %v703_v25, %v705_v32 }
 0x301   :  { %v668_v49 = vrot.slane %v667_v15, 4  ;;  %v675_v21 = vrot.slane %v674_v16, 4  ;;  %v682_v18 = vrot.slane %v681_v17, 4  ;;  %v689_v23 = vrot.slane %v688_v19, 4 }
 0x303   :  { %v669_v26 = vadd.f32 %v668_v49, %v667_v15  ;;  %v676_v27 = vadd.f32 %v675_v21, %v674_v16  ;;  %v683_v20 = vadd.f32 %v682_v18, %v681_v17  ;;  %v690_v29 = vadd.f32 %v689_v23, %v688_v19 }
 0x305   :  { %v670_v14 = vrot.slane %v669_v26, 2  ;;  %v677_v30 = vrot.slane %v676_v27, 2  ;;  %v684_v28 = vrot.slane %v683_v20, 2  ;;  %v691_v31 = vrot.slane %v690_v29, 2 }
 0x307   :  { %v671_v33 = vadd.f32 %v670_v14, %v669_v26  ;;  %v678_v34 = vadd.f32 %v677_v30, %v676_v27  ;;  %v685_v35 = vadd.f32 %v684_v28, %v683_v20  ;;  %v692_v36 = vadd.f32 %v691_v31, %v690_v29 }
 0x309   :  { %v672_v37 = vrot.slane %v671_v33, 1  ;;  %v679_v38 = vrot.slane %v678_v34, 1  ;;  %v686_v39 = vrot.slane %v685_v35, 1  ;;  %v693_v40 = vrot.slane %v692_v36, 1 }
 0x30b   :  { %v673_v42 = vadd.f32 %v672_v37, %v671_v33  ;;  %v680_v43 = vadd.f32 %v679_v38, %v678_v34  ;;  %v687_v44 = vadd.f32 %v686_v39, %v685_v35  ;;  %v694_v45 = vadd.f32 %v693_v40, %v692_v36 }
 0x30d   :  { %v699_v46 = vcombine.low %v673_v42, %v680_v43  ;;  %v700_v47 = vcombine.low %v687_v44, %v694_v45 }
 0x30f   :  { %v707_v48 = vrot.slane %v699_v46, %v706_v41  ;;  %v714_v50 = vrot.slane %v700_v47, %v706_v41 }
 0x311   :  { %v715_v52 = vcombine.low %v707_v48, %v714_v50 }
 0x313   :  { %v722_v53 = vrot.slane %v715_v52, %v706_v41 }
 0x315   :  { %728 = vst.msk [vmem:[#allocation8] sm:$0xf] %vm726_vm1, %v722_v53 }
 0x316   :  { %1196 = shalt.err (!%p1193_p6)
}
 0x317   :  { %s1197_s3 = scalar_lea.hbm %s1428_s7, 64 }
 0x318   :  { %p1198_p7 = scmp.ne.s32.totalorder %s1428_s7, %s1197_s3  ;;  %p1201_p8 = scmp.lt.u32.totalorder %s1197_s3, %s1428_s7 }
 0x31a   :  { %p1203_p9 = pnand %p1201_p8, %p1198_p7 }
 0x31c   :  { %1206 = shalt.err (!%p1203_p9)
}
 0x31d   :  { %738 = dma.vmem_to_hbm [thread:$0]  %s736_s4, 64, %s1428_s7, [#allocation5]  }
 0x31e   :  { %1211 = dma.done.wait [#allocation5], 64  }
 0x31f   :  { %1212 = vsyncadd [#allocation5], 4294967232 }
 0x320   :  { %742 = vsyncpa [#allocation4], 1 }
 0x321   :  { %743 = vsyncpa [#allocation7], 1 }
 0x322   :  { %744 = vsyncpa [#allocation5], 1 }

</bundles_post_ra>
